<compile_context>
chip_gen: v7x
topology: tpu7x:2x2x1
jax: 0.10.0
libtpu: 0.0.40
codegen_flags: <defaults>
</compile_context>

<pallas_src>
import jax
import jax.numpy as jnp
from jax.experimental import pallas as pl
from jax.experimental.pallas import tpu as pltpu

_HID_RAW = 500   # logical hidden width of the module
_HID_PAD = 512   # padded to a multiple of 128 (and 256) for the MXU


def _round_up(n, m):
    return ((n + m - 1) // m) * m


def classifier_kernel(x_ref, w1_ref, b1_ref, w2_ref, b2_ref, o_ref):
    """Whole MLP hot path in one kernel: two bf16 MXU matmuls + f32 bias/LeakyReLU."""
    x = x_ref[...]                                                   # (TB, H) bf16
    h = jnp.dot(x, w1_ref[...], preferred_element_type=jnp.float32)  # (TB, 512) f32
    h = h + b1_ref[...]                                              # single broadcast add
    h = jnp.maximum(h, 0.01 * h)                                     # LeakyReLU(0.01)
    h = h.astype(w2_ref.dtype)                                       # back to bf16 for MXU
    y = jnp.dot(h, w2_ref[...], preferred_element_type=jnp.float32)  # (TB, Cpad) f32
    y = y + b2_ref[...]
    y = jnp.maximum(y, 0.01 * y)
    o_ref[...] = y.astype(o_ref.dtype)


def classifier_forward(x, w1, b1, w2, b2, *, tb_max=512):
    """Forward pass of Classifier.

    x:  (B, H) float
    w1: (H, 500), b1: (500,) or (1, 500)
    w2: (500, C), b2: (C,)  or (1, C)
    returns (B, C) float32
    """
    B, H = x.shape
    C = w2.shape[1]
    c_pad = _round_up(max(C, 128), 128)

    # --- pad & cast parameters (zero padding is numerically inert through LeakyReLU) ---
    w1p = jnp.zeros((H, _HID_PAD), jnp.bfloat16).at[:, :_HID_RAW].set(
        w1.astype(jnp.bfloat16))
    b1p = jnp.zeros((1, _HID_PAD), jnp.float32).at[:, :_HID_RAW].set(
        b1.reshape(1, -1).astype(jnp.float32))
    w2p = jnp.zeros((_HID_PAD, c_pad), jnp.bfloat16).at[:_HID_RAW, :C].set(
        w2.astype(jnp.bfloat16))
    b2p = jnp.zeros((1, c_pad), jnp.float32).at[:, :C].set(
        b2.reshape(1, -1).astype(jnp.float32))

    # --- pad & cast activations; choose batch tile ---
    if B <= tb_max:
        tb = _round_up(B, 8)          # single block, sublane-aligned
    else:
        tb = tb_max                   # tiled batch, weights stay VMEM-resident
    b_pad = _round_up(B, tb)
    xp = jnp.zeros((b_pad, H), jnp.bfloat16).at[:B, :].set(x.astype(jnp.bfloat16))

    n_tiles = b_pad // tb

    flops = 2 * b_pad * (H * _HID_PAD + _HID_PAD * c_pad)
    bytes_accessed = (xp.size * 2 + w1p.size * 2 + w2p.size * 2
                      + b1p.size * 4 + b2p.size * 4 + b_pad * c_pad * 4)
    cost = pl.CostEstimate(flops=flops, transcendentals=0,
                           bytes_accessed=bytes_accessed)

    if n_tiles == 1:
        # Tiny problem: no grid -> no per-step pipeline bookkeeping; the whole
        # problem lives in VMEM for the duration of the kernel.
        out_pad = pl.pallas_call(
            classifier_kernel,
            out_shape=jax.ShapeDtypeStruct((b_pad, c_pad), jnp.float32),
            in_specs=[pl.BlockSpec(memory_space=pltpu.MemorySpace.VMEM)] * 5,
            out_specs=pl.BlockSpec(memory_space=pltpu.MemorySpace.VMEM),
            cost_estimate=cost,
            compiler_params=pltpu.CompilerParams(
                vmem_limit_bytes=48 * 1024 * 1024),
        )(xp, w1p, b1p, w2p, b2p)
    else:
        # Batch-tiled path: x / out stream through VMEM (double-buffered by
        # BlockSpec), weights + biases are resident (index_map always (0, 0)).
        out_pad = pl.pallas_call(
            classifier_kernel,
            out_shape=jax.ShapeDtypeStruct((b_pad, c_pad), jnp.float32),
            grid=(n_tiles,),
            in_specs=[
                pl.BlockSpec((tb, H), lambda i: (i, 0)),
                pl.BlockSpec((H, _HID_PAD), lambda i: (0, 0)),
                pl.BlockSpec((1, _HID_PAD), lambda i: (0, 0)),
                pl.BlockSpec((_HID_PAD, c_pad), lambda i: (0, 0)),
                pl.BlockSpec((1, c_pad), lambda i: (0, 0)),
            ],
            out_specs=pl.BlockSpec((tb, c_pad), lambda i: (i, 0)),
            cost_estimate=cost,
            compiler_params=pltpu.CompilerParams(
                dimension_semantics=("parallel",),   # v7x: shard batch across 2 TCs
                vmem_limit_bytes=48 * 1024 * 1024),  # fits v7x's 64 MiB VMEM
        )(xp, w1p, b1p, w2p, b2p)

    return out_pad[:B, :C]


def init_params(key, hidden_dim, num_classes):
    """Parameter init matching the module: xavier_normal weights, torch-default bias.

    Weights are stored transposed as (in, out) for the kernel.
    """
    k1, k2, k3, k4 = jax.random.split(key, 4)

    def xavier_normal(k, fan_in, fan_out):
        std = (2.0 / (fan_in + fan_out)) ** 0.5
        return std * jax.random.normal(k, (fan_in, fan_out), dtype=jnp.float32)

    def bias_uniform(k, fan_in, out_dim):
        bound = 1.0 / (fan_in ** 0.5)
        return jax.random.uniform(k, (1, out_dim), dtype=jnp.float32,
                                  minval=-bound, maxval=bound)

    w1 = xavier_normal(k1, hidden_dim, _HID_RAW)
    b1 = bias_uniform(k2, hidden_dim, _HID_RAW)
    w2 = xavier_normal(k3, _HID_RAW, num_classes)
    b2 = bias_uniform(k4, _HID_RAW, num_classes)
    return w1, b1, w2, b2


def _reference(x, w1, b1, w2, b2):
    h = x @ w1 + b1.reshape(1, -1)
    h = jnp.where(h > 0, h, 0.01 * h)
    y = h @ w2 + b2.reshape(1, -1)
    return jnp.where(y > 0, y, 0.01 * y)


if __name__ == "__main__":
    hidden_dim = 32
    num_classes = 10

    key = jax.random.PRNGKey(0)
    kx, kp, kx2 = jax.random.split(key, 3)
    w1, b1, w2, b2 = init_params(kp, hidden_dim, num_classes)

    # --- small batch: single-block (no-grid) path ---
    batch = 8
    x = jax.random.normal(kx, (batch, hidden_dim), dtype=jnp.float32)
    out = jax.block_until_ready(classifier_forward(x, w1, b1, w2, b2))
    ref = _reference(x, w1, b1, w2, b2)
    assert out.shape == (batch, num_classes)
    assert jnp.allclose(out, ref, atol=2e-2, rtol=2e-2), "small-batch mismatch"

    # --- slightly larger batch with a tiny tile cap to exercise the tiled grid path ---
    batch2 = 24
    x2 = jax.random.normal(kx2, (batch2, hidden_dim), dtype=jnp.float32)
    out2 = jax.block_until_ready(classifier_forward(x2, w1, b1, w2, b2, tb_max=8))
    ref2 = _reference(x2, w1, b1, w2, b2)
    assert out2.shape == (batch2, num_classes)
    assert jnp.allclose(out2, ref2, atol=2e-2, rtol=2e-2), "tiled-batch mismatch"

    print("KERNEL_OK")
</pallas_src>

<mosaic_0001>
module attributes {stable_mosaic.version = 11 : i64} {
  func.func @classifier_kernel(%arg0: memref<8x32xbf16, #tpu.memory_space<vmem>>, %arg1: memref<32x512xbf16, #tpu.memory_space<vmem>>, %arg2: memref<1x512xf32, #tpu.memory_space<vmem>>, %arg3: memref<512x128xbf16, #tpu.memory_space<vmem>>, %arg4: memref<1x128xf32, #tpu.memory_space<vmem>>, %arg5: memref<8x128xf32, #tpu.memory_space<vmem>>) attributes {dimension_semantics = [], scalar_prefetch = 0 : i64, scratch_operands = 0 : i64, tpu.core_type = #tpu.core_type<tc>} {
    %c0 = arith.constant 0 : index
    %c0_0 = arith.constant 0 : index
    %0 = vector.load %arg0[%c0, %c0_0] : memref<8x32xbf16, #tpu.memory_space<vmem>>, vector<8x32xbf16>
    %c0_1 = arith.constant 0 : index
    %c0_2 = arith.constant 0 : index
    %1 = vector.load %arg1[%c0_1, %c0_2] : memref<32x512xbf16, #tpu.memory_space<vmem>>, vector<32x512xbf16>
    %cst = arith.constant dense<0.000000e+00> : vector<8x512xf32>
    %2 = tpu.matmul %0, %1, %cst {dimension_numbers = #tpu.dot_dimension_numbers<[1], [0], [0], [1], [0, 0, 1, 1], [], []>} : vector<8x32xbf16>, vector<32x512xbf16>, vector<8x512xf32> -> vector<8x512xf32>
    %c0_3 = arith.constant 0 : index
    %c0_4 = arith.constant 0 : index
    %3 = vector.load %arg2[%c0_3, %c0_4] : memref<1x512xf32, #tpu.memory_space<vmem>>, vector<1x512xf32>
    %4 = vector.broadcast %3 : vector<1x512xf32> to vector<8x512xf32>
    %5 = arith.addf %2, %4 : vector<8x512xf32>
    %cst_5 = arith.constant 0.00999999977 : f32
    %6 = vector.broadcast %cst_5 : f32 to vector<8x512xf32>
    %7 = arith.mulf %6, %5 : vector<8x512xf32>
    %8 = arith.maximumf %5, %7 : vector<8x512xf32>
    %9 = arith.truncf %8 : vector<8x512xf32> to vector<8x512xbf16>
    %c0_6 = arith.constant 0 : index
    %c0_7 = arith.constant 0 : index
    %10 = vector.load %arg3[%c0_6, %c0_7] : memref<512x128xbf16, #tpu.memory_space<vmem>>, vector<512x128xbf16>
    %cst_8 = arith.constant dense<0.000000e+00> : vector<8x128xf32>
    %11 = tpu.matmul %9, %10, %cst_8 {dimension_numbers = #tpu.dot_dimension_numbers<[1], [0], [0], [1], [0, 0, 1, 1], [], []>} : vector<8x512xbf16>, vector<512x128xbf16>, vector<8x128xf32> -> vector<8x128xf32>
    %c0_9 = arith.constant 0 : index
    %c0_10 = arith.constant 0 : index
    %12 = vector.load %arg4[%c0_9, %c0_10] : memref<1x128xf32, #tpu.memory_space<vmem>>, vector<1x128xf32>
    %13 = vector.broadcast %12 : vector<1x128xf32> to vector<8x128xf32>
    %14 = arith.addf %11, %13 : vector<8x128xf32>
    %cst_11 = arith.constant 0.00999999977 : f32
    %15 = vector.broadcast %cst_11 : f32 to vector<8x128xf32>
    %16 = arith.mulf %15, %14 : vector<8x128xf32>
    %17 = arith.maximumf %14, %16 : vector<8x128xf32>
    %c0_12 = arith.constant 0 : index
    %c0_13 = arith.constant 0 : index
    %18 = vector.load %arg5[%c0_12, %c0_13] : memref<8x128xf32, #tpu.memory_space<vmem>>, vector<8x128xf32>
    tpu.vector_store %arg5[%c0_12, %c0_13], %17 {strides = array<i32>} : memref<8x128xf32, #tpu.memory_space<vmem>>, vector<8x128xf32>,
    return
  }
}

</mosaic_0001>

<bundles_post_ra>
// kernel: tpu_custom_call.1
= control target key start
LH: loop header
LB: loop body
LE: loop exit
PB: predicated region body
PF: predicated region fallthrough
CT: control target
= control target key end

     0   :  { %10 = vsyncpa [#allocation3], 0  ;;  %s919_s0 = inlined_call_operand.hbm [shape: bf16[8,32], index: 0, kind: input, shape index: {}]   ;;  %s920_s1 = inlined_call_operand.hbm [shape: bf16[32,512], index: 1, kind: input, shape index: {}]   ;;  %s921_s2 = inlined_call_operand.vmem [shape: f32[1,512], index: 2, kind: input, shape index: {}]   ;;  %s922_s3 = inlined_call_operand.hbm [shape: bf16[512,128], index: 3, kind: input, shape index: {}]   ;;  %s923_s4 = inlined_call_operand.vmem [shape: f32[1,128], index: 4, kind: input, shape index: {}]   ;;  %s924_s5 = inlined_call_operand.hbm [shape: f32[8,128], index: 5, kind: output, shape index: {}]  }
   0x1   :  { %11 = vsyncpa [#allocation6], 0 }
   0x2   :  { %12 = vsyncpa [#allocation4], 0  ;;  %s826_s18 = smov [#allocation5]   ;;  %s732_s22 = scalar_lea.hbm %s920_s1, 1024 }
   0x3   :  { %s28_s19 = sshll.u32 %s826_s18, 4  ;;  %p733_p0 = scmp.ne.s32.totalorder %s920_s1, %s732_s22  ;;  %s29_s19 = int_to_ptr.vmem [resolvable:$true] %s28_s19 }
   0x4   :  { %p736_p1 = scmp.lt.u32.totalorder %s732_s22, %s920_s1 }
   0x6   :  { %p738_p2 = pnand %p736_p1, %p733_p0 }
   0x8   :  { %741 = shalt.err (!%p738_p2)
}
   0x9   :  { %s742_s27 = scalar_lea.vmem %s29_s19, 1024  ;;  %p747_p4 = scmp.lt.s32.totalorder %s29_s19, %s29_s19 }
   0xa   :  { %p743_p3 = scmp.ne.s32.totalorder %s29_s19, %s742_s27  ;;  %p748_p5 = scmp.lt.s32.totalorder %s742_s27, %s742_s27 }
   0xc   :  { %p749_p6 = por %p748_p5, %p747_p4 }
   0xe   :  { %p750_p7 = pnand %p749_p6, %p743_p3 }
  0x10   :  { %753 = shalt.err (!%p750_p7)
}
  0x11   :  { %s827_s28 = smov 256   ;;  %s828_s29 = smov 16  }
  0x12   :  { %34 = dma.hbm_to_vmem [thread:$0]  %s920_s1, 1024, %s29_s19, [#allocation6], %s827_s28, %s827_s28, %s828_s29  }
  0x13   :  { %s829_s7 = smov [#allocation2]   ;;  %s830_s9 = smov [#allocation7]  }
  0x14   :  { %s19_s8 = sshll.u32 %s829_s7, 4  ;;  %s42_s10 = sshll.u32 %s830_s9, 4  ;;  %s20_s8 = int_to_ptr.vmem [resolvable:$true] %s19_s8  ;;  %s43_s10 = int_to_ptr.vmem [resolvable:$true] %s42_s10 }
  0x15   :  { %s754_s13 = scalar_lea.hbm %s919_s0, 64 }
  0x16   :  { %p755_p8 = scmp.ne.s32.totalorder %s919_s0, %s754_s13  ;;  %p758_p9 = scmp.lt.u32.totalorder %s754_s13, %s919_s0 }
  0x18   :  { %p760_p10 = pnand %p758_p9, %p755_p8 }
  0x1a   :  { %763 = shalt.err (!%p760_p10)
}
  0x1b   :  { %s764_s1 = scalar_lea.vmem %s20_s8, 64  ;;  %p769_p12 = scmp.lt.s32.totalorder %s20_s8, %s20_s8 }
  0x1c   :  { %p765_p11 = scmp.ne.s32.totalorder %s20_s8, %s764_s1  ;;  %p770_p13 = scmp.lt.s32.totalorder %s764_s1, %s764_s1 }
  0x1e   :  { %p771_p0 = por %p770_p13, %p769_p12 }
  0x20   :  { %p772_p1 = pnand %p771_p0, %p765_p11 }
  0x22   :  { %775 = shalt.err (!%p772_p1)
}
  0x23   :  { %22 = dma.hbm_to_vmem [thread:$0]  %s919_s0, 64, %s20_s8, [#allocation3]  }
  0x24   :  { %s776_s22 = scalar_lea.hbm %s922_s3, 4096 }
  0x25   :  { %p777_p2 = scmp.ne.s32.totalorder %s922_s3, %s776_s22  ;;  %p780_p3 = scmp.lt.u32.totalorder %s776_s22, %s922_s3 }
  0x27   :  { %p782_p4 = pnand %p780_p3, %p777_p2 }
  0x29   :  { %785 = shalt.err (!%p782_p4)
}
  0x2a   :  { %s786_s27 = scalar_lea.vmem %s43_s10, 4096  ;;  %p791_p6 = scmp.lt.s32.totalorder %s43_s10, %s43_s10 }
  0x2b   :  { %p787_p5 = scmp.ne.s32.totalorder %s43_s10, %s786_s27  ;;  %p792_p7 = scmp.lt.s32.totalorder %s786_s27, %s786_s27 }
  0x2d   :  { %p793_p8 = por %p792_p7, %p791_p6 }
  0x2f   :  { %p794_p9 = pnand %p793_p8, %p787_p5 }
  0x31   :  { %797 = shalt.err (!%p794_p9)
}
  0x32   :  { %s831_s0 = smov 64   ;;  %s832_s28 = smov 4  }
  0x33   :  { %48 = dma.hbm_to_vmem [thread:$0]  %s922_s3, 4096, %s43_s10, [#allocation6], %s831_s0, %s831_s0, %s832_s28  }
  0x34   :  { %820 = dma.done.wait [#allocation3], 64  }
  0x35   :  { %821 = vsyncadd [#allocation3], 4294967232 }
  0x36   :  { %822 = dma.done.wait [#allocation6], 5120  }
  0x37   :  { %823 = vsyncadd [#allocation6], 4294962176  ;;  %v833_v0 = vmov 0   ;;  %v688_v1 = vld [vmem:[#allocation5 + $0x4] ss:$16 sps:$4 sm:$0xff]   ;;  %vm132_vm0 = vcmask 261120   ;;  %v72_v42 = vlaneseq }
  0x38   :  { %168 = vmatprep.mubr.bf16.mxu0 %v833_v0  ;;  %209 = vmatprep.mubr.bf16.mxu1 %v833_v0  ;;  %v690_v2 = vld [vmem:[#allocation5 + $0xc] ss:$16 sps:$4 sm:$0xff]   ;;  %v692_v3 = vld [vmem:[#allocation5] ss:$16 sps:$4 sm:$0xff]   ;;  %v693_v4 = vld [vmem:[#allocation5 + $0x8] ss:$16 sps:$4 sm:$0xff]  }
  0x39   :  { %136 = vmatprep.subr.bf16.mxu0 %v688_v1  ;;  %177 = vmatprep.subr.bf16.mxu1 %v690_v2  ;;  %v694_v5 = vld [vmem:[#allocation5 + $0x24] ss:$16 sps:$4 sm:$0xff]   ;;  %v696_v6 = vld [vmem:[#allocation5 + $0x2c] ss:$16 sps:$4 sm:$0xff]   ;;  %v698_v7 = vld [vmem:[#allocation5 + $0x20] ss:$16 sps:$4 sm:$0xff]  }
  0x3a   :  { %137 = vmatpush1.bf16.msra.mxu0 %v692_v3  ;;  %178 = vmatpush1.bf16.msra.mxu1 %v693_v4  ;;  %v699_v8 = vld [vmem:[#allocation5 + $0x28] ss:$16 sps:$4 sm:$0xff]   ;;  %v61_v9 = vld [vmem:[#allocation2] sm:$0xf]  ;;  %v700_v10 = vld [vmem:[#allocation7 + $0x40] sm:$0xff]   ;;  %v73_v43 = vshrl.u32 %v72_v42, 7 }
  0x3b   :  { %138 = vmatprep.subr.bf16.mxu0 %v694_v5  ;;  %179 = vmatprep.subr.bf16.mxu1 %v696_v6  ;;  %v701_v11 = vld [vmem:[#allocation7 + $0xc0] sm:$0xff]   ;;  %v704_v14 = vld [vmem:[#allocation7 + $0x48] sm:$0xff]   ;;  %v708_v18 = vld [vmem:[#allocation7 + $0x50] sm:$0xff]   ;;  %s834_s8 = smov [#allocation8]  }
  0x3c   :  { %v702_v12 = vld [vmem:[#allocation7] sm:$0xff]   ;;  %v705_v15 = vld [vmem:[#allocation7 + $0xc8] sm:$0xff]   ;;  %v709_v19 = vld [vmem:[#allocation7 + $0xd0] sm:$0xff]   ;;  %v74_v44 = vsub.s32 0, %v73_v43  ;;  %v82_v45 = vsub.s32 2, %v73_v43  ;;  %v78_v47 = vsub.s32 1, %v73_v43 }
  0x3d   :  { %v703_v13 = vld [vmem:[#allocation7 + $0x80] sm:$0xff]   ;;  %v706_v16 = vld [vmem:[#allocation7 + $0x8] sm:$0xff]   ;;  %v710_v20 = vld [vmem:[#allocation7 + $0x10] sm:$0xff]   ;;  %v86_v48 = vsub.s32 3, %v73_v43  ;;  %s582_s9 = sshll.u32 %s834_s8, 4  ;;  %s583_s9 = int_to_ptr.vmem [resolvable:$true] %s582_s9 }
  0x3e   :  { %139 = vmatpush1.bf16.msra.mxu0 %v698_v7  ;;  %180 = vmatpush1.bf16.msra.mxu1 %v699_v8  ;;  %v707_v17 = vld [vmem:[#allocation7 + $0x88] sm:$0xff]   ;;  %v711_v21 = vld [vmem:[#allocation7 + $0x90] sm:$0xff]   ;;  %v712_v22 = vld [vmem:[#allocation7 + $0x58] sm:$0xff]   ;;  %s798_s10 = scalar_lea.vmem %s583_s9, 128  ;;  %p803_p11 = scmp.lt.s32.totalorder %s583_s9, %s583_s9 }
  0x3f   :  { %635 = vmatprep.subr.bf16.mxu0 %v700_v10  ;;  %657 = vmatprep.subr.bf16.mxu1 %v701_v11  ;;  %v713_v23 = vld [vmem:[#allocation7 + $0xd8] sm:$0xff]   ;;  %v716_v26 = vld [vmem:[#allocation7 + $0x60] sm:$0xff]   ;;  %v720_v30 = vld [vmem:[#allocation7 + $0x68] sm:$0xff]   ;;  %p799_p10 = scmp.ne.s32.totalorder %s583_s9, %s798_s10  ;;  %p804_p12 = scmp.lt.s32.totalorder %s798_s10, %s798_s10 }
  0x40   :  { %v714_v24 = vld [vmem:[#allocation7 + $0x18] sm:$0xff]   ;;  %v717_v27 = vld [vmem:[#allocation7 + $0xe0] sm:$0xff]   ;;  %v721_v31 = vld [vmem:[#allocation7 + $0xe8] sm:$0xff]  }
  0x41   :  { %600 = vmatmul.mubr.msk.bf16.vlgmr.msra.gmra.mrb[0].mxu0 %vm132_vm0, %v61_v9  ;;  %601 = vmatmul.mubr.msk.bf16.vlgmr.msra.gmra.mrb[0].mxu1 %vm132_vm0, %v61_v9  ;;  %v715_v25 = vld [vmem:[#allocation7 + $0x98] sm:$0xff]   ;;  %v718_v28 = vld [vmem:[#allocation7 + $0x20] sm:$0xff]   ;;  %v722_v32 = vld [vmem:[#allocation7 + $0x28] sm:$0xff]   ;;  %p805_p13 = por %p804_p12, %p803_p11 }
  0x42   :  { %636 = vmatpush3.bf16.msra.mxu0 %v702_v12  ;;  %658 = vmatpush3.bf16.msra.mxu1 %v703_v13  ;;  %v719_v29 = vld [vmem:[#allocation7 + $0xa0] sm:$0xff]   ;;  %v723_v33 = vld [vmem:[#allocation7 + $0xa8] sm:$0xff]   ;;  %v724_v34 = vld [vmem:[#allocation7 + $0x70] sm:$0xff]  }
  0x43   :  { %637 = vmatprep.subr.bf16.mxu0 %v704_v14  ;;  %659 = vmatprep.subr.bf16.mxu1 %v705_v15  ;;  %v725_v35 = vld [vmem:[#allocation7 + $0xf0] sm:$0xff]   ;;  %v728_v38 = vld [vmem:[#allocation7 + $0x78] sm:$0xff]   ;;  %p806_p0 = pnand %p805_p13, %p799_p10 }
  0x44   :  { %v726_v36 = vld [vmem:[#allocation7 + $0x30] sm:$0xff]   ;;  %v729_v39 = vld [vmem:[#allocation7 + $0xf8] sm:$0xff]  }
  0x45   :  { %v727_v37 = vld [vmem:[#allocation7 + $0xb0] sm:$0xff]   ;;  %v730_v40 = vld [vmem:[#allocation7 + $0x38] sm:$0xff]  }
  0x46   :  { %638 = vmatpush3.bf16.msra.mxu0 %v706_v16  ;;  %660 = vmatpush3.bf16.msra.mxu1 %v707_v17  ;;  %v731_v41 = vld [vmem:[#allocation7 + $0xb8] sm:$0xff]  }
  0x47   :  { %639 = vmatprep.subr.bf16.mxu0 %v708_v18  ;;  %661 = vmatprep.subr.bf16.mxu1 %v709_v19  ;;  %v70_v46 = vld [vmem:[%s921_s2] sm:$0xf] }
  0x48   :  { %v75_v49 = vrot.slane %v70_v46, %v74_v44  ;;  %v83_v50 = vrot.slane %v70_v46, %v82_v45  ;;  %v79_v51 = vrot.slane %v70_v46, %v78_v47  ;;  %v87_v52 = vrot.slane %v70_v46, %v86_v48  ;;  %v602_v15 = vld [vmem:[%s923_s4] ss:$0 sm:$0xff] }
  0x4a   :  { %640 = vmatpush3.bf16.msra.mxu0 %v710_v20  ;;  %662 = vmatpush3.bf16.msra.mxu1 %v711_v21 }
  0x4b   :  { %641 = vmatprep.subr.bf16.mxu0 %v712_v22  ;;  %663 = vmatprep.subr.bf16.mxu1 %v713_v23 }
  0x4e   :  { %642 = vmatpush3.bf16.msra.mxu0 %v714_v24  ;;  %664 = vmatpush3.bf16.msra.mxu1 %v715_v25 }
  0x4f   :  { %643 = vmatprep.subr.bf16.mxu0 %v716_v26  ;;  %665 = vmatprep.subr.bf16.mxu1 %v717_v27 }
  0x52   :  { %644 = vmatpush3.bf16.msra.mxu0 %v718_v28  ;;  %666 = vmatpush3.bf16.msra.mxu1 %v719_v29 }
  0x53   :  { %645 = vmatprep.subr.bf16.mxu0 %v720_v30  ;;  %667 = vmatprep.subr.bf16.mxu1 %v721_v31 }
  0x56   :  { %646 = vmatpush3.bf16.msra.mxu0 %v722_v32  ;;  %668 = vmatpush3.bf16.msra.mxu1 %v723_v33 }
  0x57   :  { %647 = vmatprep.subr.bf16.mxu0 %v724_v34  ;;  %669 = vmatprep.subr.bf16.mxu1 %v725_v35 }
  0x5a   :  { %648 = vmatpush3.bf16.msra.mxu0 %v726_v36  ;;  %670 = vmatpush3.bf16.msra.mxu1 %v727_v37 }
  0x5b   :  { %649 = vmatprep.subr.bf16.mxu0 %v728_v38  ;;  %671 = vmatprep.subr.bf16.mxu1 %v729_v39 }
  0x5e   :  { %650 = vmatpush3.bf16.msra.mxu0 %v730_v40  ;;  %672 = vmatpush3.bf16.msra.mxu1 %v731_v41 }
 0x114   :  { %v170_v53 = vpop.f32.mrb[0].mxu0  ;;  %v211_v54 = vpop.f32.mrb[0].mxu1 }
 0x115   :  { %v171_v55 = vadd.f32 %v170_v53, %v75_v49  ;;  %v212_v56 = vadd.f32 %v211_v54, %v83_v50  ;;  %v172_v57 = vpop.f32.mrb[1].mxu0  ;;  %v213_v58 = vpop.f32.mrb[1].mxu1 }
 0x116   :  { %v173_v59 = vadd.f32 %v172_v57, %v79_v51  ;;  %v214_v60 = vadd.f32 %v213_v58, %v87_v52  ;;  %v174_v61 = vpop.f32.mrb[2].mxu0  ;;  %v215_v62 = vpop.f32.mrb[2].mxu1 }
 0x117   :  { %v218_v63 = vmul.f32 0.01, %v171_v55  ;;  %v220_v0 = vmul.f32 0.01, %v212_v56  ;;  %v175_v1 = vpop.f32.mrb[3].mxu0  ;;  %v216_v2 = vpop.f32.mrb[3].mxu1 }
 0x118   :  { %v219_v3 = vmul.f32 0.01, %v173_v59  ;;  %v221_v4 = vmul.f32 0.01, %v214_v60 }
 0x119   :  { %v222_v5 = vmax.f32 %v171_v55, %v218_v63  ;;  %v224_v6 = vmax.f32 %v212_v56, %v220_v0 }
 0x11a   :  { %v223_v7 = vmax.f32 %v173_v59, %v219_v3  ;;  %v225_v8 = vmax.f32 %v214_v60, %v221_v4 }
 0x11b   :  { %v226_v11 = vpack.c.bf16 %v222_v5, %v222_v5  ;;  %v228_v12 = vpack.c.bf16 %v224_v6, %v224_v6 }
 0x11c   :  { %v227_v9 = vpack.c.bf16 %v223_v7, %v223_v7  ;;  %v229_v10 = vpack.c.bf16 %v225_v8, %v225_v8 }
 0x11e   :  { %525 = vmatprep.mubr.bf16.mxu0 %v227_v9  ;;  %565 = vmatprep.mubr.bf16.mxu1 %v229_v10 }
 0x11f   :  { %526 = vmatmul.mubr.bf16.vlgmr.msra.gmra.mrb[4].mxu0 %v226_v11  ;;  %566 = vmatmul.mubr.bf16.vlgmr.msra.gmra.mrb[4].mxu1 %v228_v12 }
 0x1f2   :  { %v651_v13 = vpop.f32.mrb[4].mxu0  ;;  %v673_v14 = vpop.f32.mrb[4].mxu1 }
 0x1f3   :  { %v652_v16 = vpop.f32.mrb[5].mxu0  ;;  %v674_v17 = vpop.f32.mrb[5].mxu1 }
 0x1f4   :  { %v653_v18 = vadd.f32 %v652_v16, %v651_v13  ;;  %v675_v19 = vadd.f32 %v674_v17, %v673_v14  ;;  %v654_v20 = vpop.f32.mrb[6].mxu0  ;;  %v676_v21 = vpop.f32.mrb[6].mxu1 }
 0x1f5   :  { %v655_v22 = vpop.f32.mrb[7].mxu0  ;;  %v677_v23 = vpop.f32.mrb[7].mxu1 }
 0x1f6   :  { %v528_v24 = vadd.f32 %v653_v18, %v602_v15 }
 0x1f8   :  { %v568_v25 = vadd.f32 %v675_v19, %v528_v24 }
 0x1fa   :  { %v573_v26 = vmul.f32 0.01, %v568_v25 }
 0x1fc   :  { %v574_v27 = vmax.f32 %v568_v25, %v573_v26 }
 0x1fe   :  { %575 = vst [vmem:[#allocation8] sm:$0xff] %v574_v27 }
 0x1ff   :  { %809 = shalt.err (!%p806_p0)
}
 0x200   :  { %s810_s12 = scalar_lea.hbm %s924_s5, 128 }
 0x201   :  { %p811_p1 = scmp.ne.s32.totalorder %s924_s5, %s810_s12  ;;  %p814_p2 = scmp.lt.u32.totalorder %s810_s12, %s924_s5 }
 0x203   :  { %p816_p3 = pnand %p814_p2, %p811_p1 }
 0x205   :  { %819 = shalt.err (!%p816_p3)
}
 0x206   :  { %585 = dma.vmem_to_hbm [thread:$0]  %s583_s9, 128, %s924_s5, [#allocation4]  }
 0x207   :  { %824 = dma.done.wait [#allocation4], 128  }
 0x208   :  { %825 = vsyncadd [#allocation4], 4294967168 }
 0x209   :  { %589 = vsyncpa [#allocation3], 1 }
 0x20a   :  { %590 = vsyncpa [#allocation6], 1 }
 0x20b   :  { %591 = vsyncpa [#allocation4], 1 }

</bundles_post_ra>
